<compile_context>
chip_gen: v6e
topology: v6e:2x2x1
jax: 0.10.0
libtpu: 0.0.40
codegen_flags: <defaults>
</compile_context>

<pallas_src>
import functools

import jax
import jax.numpy as jnp
from jax.experimental import pallas as pl
from jax.experimental.pallas import tpu as pltpu


_LANE = 128      # TPU lane width
_TM_MAX = 8192   # M-tile width (multiple of 128); ~3.2 MB double-buffered VMEM


def _round_up(x, m):
    return (x + m - 1) // m * m


def _deconv_matmul_kernel(w_ref, x_ref, o_ref):
    # (Ndim, K) @ (K, tm) -> (Ndim, tm).  Bias is folded into the last K
    # column of w / ones-row of x, so the kernel body is a single MXU op.
    o_ref[...] = jnp.dot(w_ref[...], x_ref[...],
                         preferred_element_type=jnp.float32)


@functools.partial(jax.jit, static_argnames=("padding",))
def conv_transpose2d_k2s2(x_nchw, weight, bias, *, padding=2):
    """ConvTranspose2d with kernel=2, stride=2, symmetric `padding`.

    x_nchw : (N, Cin, H, W)    float32
    weight : (Cin, Cout, 2, 2) float32   (PyTorch ConvTranspose2d layout)
    bias   : (Cout,)           float32
    returns: (N, Cout, 2H - 2*padding, 2W - 2*padding) float32
    """
    N, Cin, H, W = x_nchw.shape
    Cout = weight.shape[1]
    KH = KW = 2
    STRIDE = 2

    # No output overlap (k == s == 2), so the `padding` crop can be pushed
    # onto the input: q border rows/cols of x never reach the kept output.
    # For padding=2: q=1, r=0 -> no residual output crop at all.
    q, r = divmod(padding, STRIDE)
    if q:
        x_nchw = x_nchw[:, :, q:H - q, q:W - q]
    H_i, W_i = H - 2 * q, W - 2 * q

    M = N * H_i * W_i            # lane-dense output axis
    Ndim = Cout * KH * KW        # 40 rows (multiple of 8 sublanes)
    K = Cin + 1                  # contraction, +1 for the folded bias

    # X^T: (Cin, M), column m = n*H_i*W_i + h*W_i + w; append ones-row.
    x_t = jnp.transpose(x_nchw, (1, 0, 2, 3)).reshape(Cin, M)
    x_aug = jnp.concatenate(
        [x_t, jnp.ones((1, M), jnp.float32)], axis=0)          # (K, M)

    # W^T: (Ndim, Cin), row j = co*4 + kh*2 + kw; append bias column.
    w_t = jnp.transpose(weight, (1, 2, 3, 0)).reshape(Ndim, Cin)
    b_col = jnp.repeat(bias, KH * KW).reshape(Ndim, 1)
    w_aug = jnp.concatenate([w_t, b_col], axis=1).astype(jnp.float32)  # (Ndim, K)

    # Lane-dense tiling over M: pad M so every tile is a full multiple of 128
    # (unmasked stores) and the grid is cdiv -> pipelining for any shape, no
    # single-block VMEM blowup.  Small problems run as one block.
    if M <= _TM_MAX:
        tm = _round_up(M, _LANE)
        m_pad = tm
    else:
        tm = _TM_MAX
        m_pad = _round_up(M, tm)
    if m_pad > M:
        x_aug = jnp.pad(x_aug, ((0, 0), (0, m_pad - M)))
    grid = (m_pad // tm,)

    y = pl.pallas_call(
        _deconv_matmul_kernel,
        out_shape=jax.ShapeDtypeStruct((Ndim, m_pad), jnp.float32),
        grid=grid,
        in_specs=[
            pl.BlockSpec((Ndim, K), lambda i: (0, 0)),   # weights+bias, resident
            pl.BlockSpec((K, tm), lambda i: (0, i)),     # X^T, tiled over M
        ],
        out_specs=pl.BlockSpec((Ndim, tm), lambda i: (0, i)),
        compiler_params=pltpu.CompilerParams(
            dimension_semantics=("parallel",)),          # M tiles independent
    )(w_aug, x_aug)

    # TODO(synk): on v7x a CORE_PARALLEL grid axis would split M tiles across
    # both TensorCores; kept the portable "parallel" semantics here.
    # TODO(synk): the (kh,kw) spatial interleave below is one fused XLA
    # transpose pass over the output; doing it in-kernel needs a lane
    # interleave (risky Mosaic relayout), so it is left in jitted glue.
    y = y[:, :M].reshape(Cout, KH, KW, N, H_i, W_i)
    y = jnp.transpose(y, (3, 0, 4, 1, 5, 2))          # (N, Cout, H_i, KH, W_i, KW)
    full = y.reshape(N, Cout, STRIDE * H_i, STRIDE * W_i)
    if r:
        full = full[:, :, r:full.shape[2] - r, r:full.shape[3] - r]
    return full


def _reference_deconv(x, weight, bias, padding=2):
    # Pure-JAX reference for ConvTranspose2d(kernel=2, stride=2, padding).
    N, Cin, H, W = x.shape
    Cout = weight.shape[1]
    y = jnp.einsum("nchw,coyk->nohywk", x, weight)     # (N,Cout,H,KH,W,KW)
    y = y.reshape(N, Cout, 2 * H, 2 * W) + bias[None, :, None, None]
    return y[:, :, padding:2 * H - padding, padding:2 * W - padding]


class Model:
    def __init__(self, weight, bias, min_value=-200, max_value=68):
        self.weight = weight
        self.bias = bias
        self.min_value = min_value
        self.max_value = max_value

    def forward(self, x1):
        # Both ConvTranspose2d calls in the PyTorch module are identical and
        # their results are dead; compute the Pallas deconv once, reuse it.
        v1 = conv_transpose2d_k2s2(x1, self.weight, self.bias, padding=2)
        v2 = self.min_value
        v3 = self.max_value
        v4 = v1
        return v3


if __name__ == "__main__":
    key = jax.random.PRNGKey(0)
    k_x, k_w, k_b = jax.random.split(key, 3)

    # Shapes from the module spec (still tiny): N=1, Cin=5 -> Cout=10, 64x64.
    N, Cin, H, W = 1, 5, 64, 64
    Cout, KH, KW = 10, 2, 2

    x1 = jax.random.normal(k_x, (N, Cin, H, W), dtype=jnp.float32)
    weight = 0.1 * jax.random.normal(k_w, (Cin, Cout, KH, KW), dtype=jnp.float32)
    bias = 0.1 * jax.random.normal(k_b, (Cout,), dtype=jnp.float32)

    model = Model(weight, bias)
    result = model.forward(x1)
    assert result == 68

    # Run the Pallas deconv (the op the module executes) and validate it
    # against a pure-JAX reference before declaring success.
    y = conv_transpose2d_k2s2(x1, weight, bias, padding=2)
    y = jax.block_until_ready(y)
    y_ref = _reference_deconv(x1, weight, bias, padding=2)
    assert y.shape == (N, Cout, 2 * H - 4, 2 * W - 4), y.shape
    assert bool(jnp.allclose(y, y_ref, atol=1e-4, rtol=1e-4)), float(
        jnp.max(jnp.abs(y - y_ref)))

    print("KERNEL_OK")
</pallas_src>

<mosaic_0001>
module attributes {stable_mosaic.version = 11 : i64} {
  func.func @_deconv_matmul_kernel(%arg0: i32, %arg1: memref<40x6xf32, #tpu.memory_space<vmem>>, %arg2: memref<6x3968xf32, #tpu.memory_space<vmem>>, %arg3: memref<40x3968xf32, #tpu.memory_space<vmem>>) attributes {dimension_semantics = [#tpu.dimension_semantics<parallel>], iteration_bounds = array<i64: 1>, scalar_prefetch = 0 : i64, scratch_operands = 0 : i64, tpu.core_type = #tpu.core_type<tc>, window_params = [{pipeline_mode = #tpu.pipeline_mode<synchronous>, transform_indices = @transform_0, window_bounds = array<i64: 40, 6>}, {transform_indices = @transform_1, window_bounds = array<i64: 6, 3968>}, {transform_indices = @transform_2, window_bounds = array<i64: 40, 3968>}]} {
    %c0 = arith.constant 0 : index
    %c0_0 = arith.constant 0 : index
    %0 = vector.load %arg1[%c0, %c0_0] : memref<40x6xf32, #tpu.memory_space<vmem>>, vector<40x6xf32>
    %c0_1 = arith.constant 0 : index
    %c0_2 = arith.constant 0 : index
    %1 = vector.load %arg2[%c0_1, %c0_2] : memref<6x3968xf32, #tpu.memory_space<vmem>>, vector<6x3968xf32>
    %cst = arith.constant dense<0.000000e+00> : vector<40x3968xf32>
    %2 = tpu.matmul %0, %1, %cst {dimension_numbers = #tpu.dot_dimension_numbers<[1], [0], [0], [1], [0, 0, 1, 1], [], []>} : vector<40x6xf32>, vector<6x3968xf32>, vector<40x3968xf32> -> vector<40x3968xf32>
    %c0_3 = arith.constant 0 : index
    %c0_4 = arith.constant 0 : index
    %3 = vector.load %arg3[%c0_3, %c0_4] : memref<40x3968xf32, #tpu.memory_space<vmem>>, vector<40x3968xf32>
    tpu.vector_store %arg3[%c0_3, %c0_4], %2 {strides = array<i32>} : memref<40x3968xf32, #tpu.memory_space<vmem>>, vector<40x3968xf32>,
    return
  }
  func.func @transform_0(%arg0: i32) -> (i32, i32) {
    %c0_i32 = arith.constant 0 : i32
    %c0_i32_0 = arith.constant 0 : i32
    %c0_i32_1 = arith.constant 0 : i32
    return %c0_i32, %c0_i32_0 : i32, i32
  }
  func.func @transform_1(%arg0: i32) -> (i32, i32) {
    %c0_i32 = arith.constant 0 : i32
    %c0_i32_0 = arith.constant 0 : i32
    return %c0_i32, %arg0 : i32, i32
  }
  func.func @transform_2(%arg0: i32) -> (i32, i32) {
    %c0_i32 = arith.constant 0 : i32
    %c0_i32_0 = arith.constant 0 : i32
    return %c0_i32, %arg0 : i32, i32
  }
}

</mosaic_0001>

<bundles_post_ra>
// kernel: conv_transpose2d_k2s2.1
= control target key start
LH: loop header
LB: loop body
LE: loop exit
PB: predicated region body
PF: predicated region fallthrough
CT: control target
= control target key end

     0   :  { %vm63_vm0 = vcmask 1045504   ;;  %vm47_vm1 = vcmask 48128   ;;  %v1967_v3 = vmov 0.0   ;;  %vm1968_vm2 = vmmov 0   ;;  %s2844_s1 = inlined_call_operand.vmem [shape: f32[6,3968], index: 1, kind: input, shape index: {}]   ;;  %s2845_s0 = inlined_call_operand.vmem [shape: f32[40,6], index: 0, kind: input, shape index: {}]   ;;  %s2846_s2 = inlined_call_operand.vmem [shape: f32[40,3968], index: 2, kind: output, shape index: {}]  }
   0x1   :  { %v17_v0 = vld [vmem:[%s2844_s1 + $0x8] sm:$0x3f]  ;;  %v19_v1 = vld [vmem:[%s2844_s1 + $0x18] sm:$0x3f]  ;;  %v16_v2 = vld [vmem:[%s2844_s1] sm:$0x3f]  ;;  %221 = vmatprep.mubr.f32.mxu0 %v1967_v3  ;;  %316 = vmatprep.mubr.f32.mxu1 %v1967_v3 }
   0x2   :  { %1831 = vmatprep.subr.msk.mxu0 %vm63_vm0, %v17_v0  ;;  %1838 = vmatprep.subr.msk.mxu1 %vm63_vm0, %v19_v1  ;;  %v18_v4 = vld [vmem:[%s2844_s1 + $0x10] sm:$0x3f]  ;;  %v2003_v5 = vld [vmem:[%s2845_s0] sm:$0xff]  ;;  %v21_v6 = vld [vmem:[%s2844_s1 + $0x28] sm:$0x3f] }
   0x3   :  { %1832 = vmatpush1.msk.msra.mxu0 %vm63_vm0, %v16_v2  ;;  %1839 = vmatpush1.msk.msra.mxu1 %vm63_vm0, %v18_v4  ;;  %v20_v7 = vld [vmem:[%s2844_s1 + $0x20] sm:$0x3f]  ;;  %v23_v8 = vld [vmem:[%s2844_s1 + $0x38] sm:$0x3f]  ;;  %v22_v9 = vld [vmem:[%s2844_s1 + $0x30] sm:$0x3f] }
   0x4   :  { %1833 = vmatmul.mubr.msk.f32.vlgmr.msra.gmra.mxu0 %vm47_vm1, %v2003_v5  ;;  %1840 = vmatmul.mubr.msk.f32.vlgmr.msra.gmra.mxu1 %vm47_vm1, %v2003_v5  ;;  %v2028_v10 = vld [vmem:[%s2845_s0 + $0x8] sm:$0xff]  ;;  %v27_v12 = vld [vmem:[%s2844_s1 + $0x58] sm:$0x3f]  ;;  %v2049_v13 = vld [vmem:[%s2845_s0 + $0x10] sm:$0xff] }
   0x5   :  { %1845 = vmatprep.subr.msk.mxu0 %vm63_vm0, %v21_v6  ;;  %1852 = vmatprep.subr.msk.mxu1 %vm63_vm0, %v23_v8  ;;  %v25_v11 = vld [vmem:[%s2844_s1 + $0x48] sm:$0x3f]  ;;  %v2062_v14 = vld [vmem:[%s2845_s0 + $0x18] sm:$0xff]  ;;  %v2073_v15 = vld [vmem:[%s2845_s0 + $0x20] sm:$0xff] }
   0x6   :  { %1846 = vmatpush1.msk.msra.mxu0 %vm63_vm0, %v20_v7  ;;  %1853 = vmatpush1.msk.msra.mxu1 %vm63_vm0, %v22_v9  ;;  %v24_v16 = vld [vmem:[%s2844_s1 + $0x40] sm:$0x3f]  ;;  %v26_v17 = vld [vmem:[%s2844_s1 + $0x50] sm:$0x3f]  ;;  %v29_v18 = vld [vmem:[%s2844_s1 + $0x68] sm:$0x3f] }
   0x7   :  { %227 = vmatprep.mubr.f32.mxu0 %v1967_v3  ;;  %322 = vmatprep.mubr.f32.mxu1 %v1967_v3  ;;  %v31_v19 = vld [vmem:[%s2844_s1 + $0x78] sm:$0x3f]  ;;  %v28_v20 = vld [vmem:[%s2844_s1 + $0x60] sm:$0x3f]  ;;  %v30_v21 = vld [vmem:[%s2844_s1 + $0x70] sm:$0x3f] }
   0x8   :  { %1834 = vmatmul.mubr.msk.f32.gmra.mxu0 %vm47_vm1, %v2028_v10  ;;  %1841 = vmatmul.mubr.msk.f32.gmra.mxu1 %vm47_vm1, %v2028_v10  ;;  %v33_v22 = vld [vmem:[%s2844_s1 + $0x88] sm:$0x3f]  ;;  %v35_v23 = vld [vmem:[%s2844_s1 + $0x98] sm:$0x3f]  ;;  %v32_v24 = vld [vmem:[%s2844_s1 + $0x80] sm:$0x3f] }
   0x9   :  { %233 = vmatprep.mubr.f32.mxu0 %v1967_v3  ;;  %328 = vmatprep.mubr.f32.mxu1 %v1967_v3  ;;  %v34_v25 = vld [vmem:[%s2844_s1 + $0x90] sm:$0x3f]  ;;  %v37_v26 = vld [vmem:[%s2844_s1 + $0xa8] sm:$0x3f]  ;;  %v39_v27 = vld [vmem:[%s2844_s1 + $0xb8] sm:$0x3f] }
   0xa   :  { %1859 = vmatprep.subr.msk.mxu0 %vm63_vm0, %v25_v11  ;;  %1866 = vmatprep.subr.msk.mxu1 %vm63_vm0, %v27_v12  ;;  %v36_v28 = vld [vmem:[%s2844_s1 + $0xa0] sm:$0x3f]  ;;  %v38_v29 = vld [vmem:[%s2844_s1 + $0xb0] sm:$0x3f]  ;;  %v41_v30 = vld [vmem:[%s2844_s1 + $0xc8] sm:$0x3f] }
   0xb   :  { %v43_v31 = vld [vmem:[%s2844_s1 + $0xd8] sm:$0x3f]  ;;  %v40_v32 = vld [vmem:[%s2844_s1 + $0xc0] sm:$0x3f]  ;;  %v42_v33 = vld [vmem:[%s2844_s1 + $0xd0] sm:$0x3f] }
   0xc   :  { %1835 = vmatmul.mubr.msk.f32.gmra.mxu0 %vm47_vm1, %v2049_v13  ;;  %1842 = vmatmul.mubr.msk.f32.gmra.mxu1 %vm47_vm1, %v2049_v13  ;;  %v45_v34 = vld [vmem:[%s2844_s1 + $0xe8] sm:$0x3f]  ;;  %v44_v35 = vld [vmem:[%s2844_s1 + $0xe0] sm:$0x3f]  ;;  %v46_v36 = vld [vmem:[%s2844_s1 + $0xf0] sm:$0x3f] }
   0xd   :  { %239 = vmatprep.mubr.f32.mxu0 %v1967_v3  ;;  %334 = vmatprep.mubr.f32.mxu1 %v1967_v3 }
  0x10   :  { %1836 = vmatmul.mubr.msk.f32.gmra.mxu0 %vm47_vm1, %v2062_v14  ;;  %1843 = vmatmul.mubr.msk.f32.gmra.mxu1 %vm47_vm1, %v2062_v14 }
  0x11   :  { %245 = vmatprep.mubr.f32.mxu0 %v1967_v3  ;;  %340 = vmatprep.mubr.f32.mxu1 %v1967_v3 }
  0x14   :  { %1837 = vmatmul.mubr.msk.f32.gmra.mxu0 %vm47_vm1, %v2073_v15  ;;  %1844 = vmatmul.mubr.msk.f32.gmra.mxu1 %vm47_vm1, %v2073_v15 }
  0x15   :  { %411 = vmatprep.mubr.f32.mxu0 %v1967_v3  ;;  %506 = vmatprep.mubr.f32.mxu1 %v1967_v3 }
  0x18   :  { %1847 = vmatmul.mubr.msk.f32.vlgmr.msra.gmra.mxu0 %vm47_vm1, %v2003_v5  ;;  %1854 = vmatmul.mubr.msk.f32.vlgmr.msra.gmra.mxu1 %vm47_vm1, %v2003_v5 }
  0x19   :  { %1860 = vmatpush1.msk.msra.mxu0 %vm63_vm0, %v24_v16  ;;  %1867 = vmatpush1.msk.msra.mxu1 %vm63_vm0, %v26_v17 }
  0x1a   :  { %417 = vmatprep.mubr.f32.mxu0 %v1967_v3  ;;  %512 = vmatprep.mubr.f32.mxu1 %v1967_v3 }
  0x1b   :  { %1873 = vmatprep.subr.msk.mxu0 %vm63_vm0, %v29_v18  ;;  %1880 = vmatprep.subr.msk.mxu1 %vm63_vm0, %v31_v19 }
  0x1c   :  { %1848 = vmatmul.mubr.msk.f32.gmra.mxu0 %vm47_vm1, %v2028_v10  ;;  %1855 = vmatmul.mubr.msk.f32.gmra.mxu1 %vm47_vm1, %v2028_v10 }
  0x1d   :  { %423 = vmatprep.mubr.f32.mxu0 %v1967_v3  ;;  %518 = vmatprep.mubr.f32.mxu1 %v1967_v3 }
  0x20   :  { %1849 = vmatmul.mubr.msk.f32.gmra.mxu0 %vm47_vm1, %v2049_v13  ;;  %1856 = vmatmul.mubr.msk.f32.gmra.mxu1 %vm47_vm1, %v2049_v13 }
  0x21   :  { %429 = vmatprep.mubr.f32.mxu0 %v1967_v3  ;;  %524 = vmatprep.mubr.f32.mxu1 %v1967_v3 }
  0x24   :  { %1850 = vmatmul.mubr.msk.f32.gmra.mxu0 %vm47_vm1, %v2062_v14  ;;  %1857 = vmatmul.mubr.msk.f32.gmra.mxu1 %vm47_vm1, %v2062_v14 }
  0x25   :  { %435 = vmatprep.mubr.f32.mxu0 %v1967_v3  ;;  %530 = vmatprep.mubr.f32.mxu1 %v1967_v3 }
  0x28   :  { %1851 = vmatmul.mubr.msk.f32.gmra.mxu0 %vm47_vm1, %v2073_v15  ;;  %1858 = vmatmul.mubr.msk.f32.gmra.mxu1 %vm47_vm1, %v2073_v15 }
  0x29   :  { %601 = vmatprep.mubr.f32.mxu0 %v1967_v3  ;;  %696 = vmatprep.mubr.f32.mxu1 %v1967_v3 }
  0x2c   :  { %1861 = vmatmul.mubr.msk.f32.vlgmr.msra.gmra.mxu0 %vm47_vm1, %v2003_v5  ;;  %1868 = vmatmul.mubr.msk.f32.vlgmr.msra.gmra.mxu1 %vm47_vm1, %v2003_v5 }
  0x2d   :  { %1874 = vmatpush1.msk.msra.mxu0 %vm63_vm0, %v28_v20  ;;  %1881 = vmatpush1.msk.msra.mxu1 %vm63_vm0, %v30_v21 }
  0x2e   :  { %607 = vmatprep.mubr.f32.mxu0 %v1967_v3  ;;  %702 = vmatprep.mubr.f32.mxu1 %v1967_v3 }
  0x2f   :  { %1887 = vmatprep.subr.msk.mxu0 %vm63_vm0, %v33_v22  ;;  %1894 = vmatprep.subr.msk.mxu1 %vm63_vm0, %v35_v23 }
  0x30   :  { %1862 = vmatmul.mubr.msk.f32.gmra.mxu0 %vm47_vm1, %v2028_v10  ;;  %1869 = vmatmul.mubr.msk.f32.gmra.mxu1 %vm47_vm1, %v2028_v10 }
  0x31   :  { %613 = vmatprep.mubr.f32.mxu0 %v1967_v3  ;;  %708 = vmatprep.mubr.f32.mxu1 %v1967_v3 }
  0x34   :  { %1863 = vmatmul.mubr.msk.f32.gmra.mxu0 %vm47_vm1, %v2049_v13  ;;  %1870 = vmatmul.mubr.msk.f32.gmra.mxu1 %vm47_vm1, %v2049_v13 }
  0x35   :  { %619 = vmatprep.mubr.f32.mxu0 %v1967_v3  ;;  %714 = vmatprep.mubr.f32.mxu1 %v1967_v3 }
  0x38   :  { %1864 = vmatmul.mubr.msk.f32.gmra.mxu0 %vm47_vm1, %v2062_v14  ;;  %1871 = vmatmul.mubr.msk.f32.gmra.mxu1 %vm47_vm1, %v2062_v14 }
  0x39   :  { %625 = vmatprep.mubr.f32.mxu0 %v1967_v3  ;;  %720 = vmatprep.mubr.f32.mxu1 %v1967_v3 }
  0x3c   :  { %1865 = vmatmul.mubr.msk.f32.gmra.mxu0 %vm47_vm1, %v2073_v15  ;;  %1872 = vmatmul.mubr.msk.f32.gmra.mxu1 %vm47_vm1, %v2073_v15 }
  0x3d   :  { %791 = vmatprep.mubr.f32.mxu0 %v1967_v3  ;;  %886 = vmatprep.mubr.f32.mxu1 %v1967_v3 }
  0x40   :  { %1875 = vmatmul.mubr.msk.f32.vlgmr.msra.gmra.mxu0 %vm47_vm1, %v2003_v5  ;;  %1882 = vmatmul.mubr.msk.f32.vlgmr.msra.gmra.mxu1 %vm47_vm1, %v2003_v5 }
  0x41   :  { %1888 = vmatpush1.msk.msra.mxu0 %vm63_vm0, %v32_v24  ;;  %1895 = vmatpush1.msk.msra.mxu1 %vm63_vm0, %v34_v25 }
  0x42   :  { %797 = vmatprep.mubr.f32.mxu0 %v1967_v3  ;;  %892 = vmatprep.mubr.f32.mxu1 %v1967_v3 }
  0x43   :  { %1901 = vmatprep.subr.msk.mxu0 %vm63_vm0, %v37_v26  ;;  %1908 = vmatprep.subr.msk.mxu1 %vm63_vm0, %v39_v27 }
  0x44   :  { %1876 = vmatmul.mubr.msk.f32.gmra.mxu0 %vm47_vm1, %v2028_v10  ;;  %1883 = vmatmul.mubr.msk.f32.gmra.mxu1 %vm47_vm1, %v2028_v10 }
  0x45   :  { %803 = vmatprep.mubr.f32.mxu0 %v1967_v3  ;;  %898 = vmatprep.mubr.f32.mxu1 %v1967_v3 }
  0x48   :  { %1877 = vmatmul.mubr.msk.f32.gmra.mxu0 %vm47_vm1, %v2049_v13  ;;  %1884 = vmatmul.mubr.msk.f32.gmra.mxu1 %vm47_vm1, %v2049_v13 }
  0x49   :  { %809 = vmatprep.mubr.f32.mxu0 %v1967_v3  ;;  %904 = vmatprep.mubr.f32.mxu1 %v1967_v3 }
  0x4c   :  { %1878 = vmatmul.mubr.msk.f32.gmra.mxu0 %vm47_vm1, %v2062_v14  ;;  %1885 = vmatmul.mubr.msk.f32.gmra.mxu1 %vm47_vm1, %v2062_v14 }
  0x4d   :  { %815 = vmatprep.mubr.f32.mxu0 %v1967_v3  ;;  %910 = vmatprep.mubr.f32.mxu1 %v1967_v3 }
  0x50   :  { %1879 = vmatmul.mubr.msk.f32.gmra.mxu0 %vm47_vm1, %v2073_v15  ;;  %1886 = vmatmul.mubr.msk.f32.gmra.mxu1 %vm47_vm1, %v2073_v15 }
  0x51   :  { %981 = vmatprep.mubr.f32.mxu0 %v1967_v3  ;;  %1076 = vmatprep.mubr.f32.mxu1 %v1967_v3 }
  0x54   :  { %1889 = vmatmul.mubr.msk.f32.vlgmr.msra.gmra.mxu0 %vm47_vm1, %v2003_v5  ;;  %1896 = vmatmul.mubr.msk.f32.vlgmr.msra.gmra.mxu1 %vm47_vm1, %v2003_v5 }
  0x55   :  { %1902 = vmatpush1.msk.msra.mxu0 %vm63_vm0, %v36_v28  ;;  %1909 = vmatpush1.msk.msra.mxu1 %vm63_vm0, %v38_v29 }
  0x56   :  { %987 = vmatprep.mubr.f32.mxu0 %v1967_v3  ;;  %1082 = vmatprep.mubr.f32.mxu1 %v1967_v3 }
  0x57   :  { %1915 = vmatprep.subr.msk.mxu0 %vm63_vm0, %v41_v30  ;;  %1922 = vmatprep.subr.msk.mxu1 %vm63_vm0, %v43_v31 }
  0x58   :  { %1890 = vmatmul.mubr.msk.f32.gmra.mxu0 %vm47_vm1, %v2028_v10  ;;  %1897 = vmatmul.mubr.msk.f32.gmra.mxu1 %vm47_vm1, %v2028_v10 }
  0x59   :  { %993 = vmatprep.mubr.f32.mxu0 %v1967_v3  ;;  %1088 = vmatprep.mubr.f32.mxu1 %v1967_v3 }
  0x5c   :  { %1891 = vmatmul.mubr.msk.f32.gmra.mxu0 %vm47_vm1, %v2049_v13  ;;  %1898 = vmatmul.mubr.msk.f32.gmra.mxu1 %vm47_vm1, %v2049_v13 }
  0x5d   :  { %999 = vmatprep.mubr.f32.mxu0 %v1967_v3  ;;  %1094 = vmatprep.mubr.f32.mxu1 %v1967_v3 }
  0x60   :  { %1892 = vmatmul.mubr.msk.f32.gmra.mxu0 %vm47_vm1, %v2062_v14  ;;  %1899 = vmatmul.mubr.msk.f32.gmra.mxu1 %vm47_vm1, %v2062_v14 }
  0x61   :  { %1005 = vmatprep.mubr.f32.mxu0 %v1967_v3  ;;  %1100 = vmatprep.mubr.f32.mxu1 %v1967_v3 }
  0x64   :  { %1893 = vmatmul.mubr.msk.f32.gmra.mxu0 %vm47_vm1, %v2073_v15  ;;  %1900 = vmatmul.mubr.msk.f32.gmra.mxu1 %vm47_vm1, %v2073_v15 }
  0x65   :  { %1171 = vmatprep.mubr.f32.mxu0 %v1967_v3  ;;  %1266 = vmatprep.mubr.f32.mxu1 %v1967_v3 }
  0x68   :  { %1903 = vmatmul.mubr.msk.f32.vlgmr.msra.gmra.mxu0 %vm47_vm1, %v2003_v5  ;;  %1910 = vmatmul.mubr.msk.f32.vlgmr.msra.gmra.mxu1 %vm47_vm1, %v2003_v5 }
  0x69   :  { %1916 = vmatpush1.msk.msra.mxu0 %vm63_vm0, %v40_v32  ;;  %1923 = vmatpush1.msk.msra.mxu1 %vm63_vm0, %v42_v33 }
  0x6a   :  { %1177 = vmatprep.mubr.f32.mxu0 %v1967_v3  ;;  %1272 = vmatprep.mubr.f32.mxu1 %v1967_v3 }
  0x6b   :  { %1929 = vmatprep.subr.msk.mxu0 %vm63_vm0, %v45_v34  ;;  %1948 = vmatprep.subr.mxu1 %v1967_v3 }
  0x6c   :  { %1904 = vmatmul.mubr.msk.f32.gmra.mxu0 %vm47_vm1, %v2028_v10  ;;  %1911 = vmatmul.mubr.msk.f32.gmra.mxu1 %vm47_vm1, %v2028_v10 }
  0x6d   :  { %1183 = vmatprep.mubr.f32.mxu0 %v1967_v3  ;;  %1278 = vmatprep.mubr.f32.mxu1 %v1967_v3 }
  0x70   :  { %1905 = vmatmul.mubr.msk.f32.gmra.mxu0 %vm47_vm1, %v2049_v13  ;;  %1912 = vmatmul.mubr.msk.f32.gmra.mxu1 %vm47_vm1, %v2049_v13 }
  0x71   :  { %1189 = vmatprep.mubr.f32.mxu0 %v1967_v3  ;;  %1284 = vmatprep.mubr.f32.mxu1 %v1967_v3 }
  0x74   :  { %1906 = vmatmul.mubr.msk.f32.gmra.mxu0 %vm47_vm1, %v2062_v14  ;;  %1913 = vmatmul.mubr.msk.f32.gmra.mxu1 %vm47_vm1, %v2062_v14 }
  0x75   :  { %1195 = vmatprep.mubr.f32.mxu0 %v1967_v3  ;;  %1290 = vmatprep.mubr.f32.mxu1 %v1967_v3 }
  0x78   :  { %1907 = vmatmul.mubr.msk.f32.gmra.mxu0 %vm47_vm1, %v2073_v15  ;;  %1914 = vmatmul.mubr.msk.f32.gmra.mxu1 %vm47_vm1, %v2073_v15 }
  0x79   :  { %1361 = vmatprep.mubr.f32.mxu0 %v1967_v3  ;;  %1456 = vmatprep.mubr.f32.mxu1 %v1967_v3 }
  0x7c   :  { %1917 = vmatmul.mubr.msk.f32.vlgmr.msra.gmra.mxu0 %vm47_vm1, %v2003_v5  ;;  %1924 = vmatmul.mubr.msk.f32.vlgmr.msra.gmra.mxu1 %vm47_vm1, %v2003_v5 }
  0x7d   :  { %1930 = vmatpush1.msk.msra.mxu0 %vm63_vm0, %v44_v35  ;;  %1949 = vmatpush3.msk.msra.mxu1 %vm63_vm0, %v46_v36 }
  0x7e   :  { %1367 = vmatprep.mubr.f32.mxu0 %v1967_v3  ;;  %1462 = vmatprep.mubr.f32.mxu1 %v1967_v3 }
  0x80   :  { %1918 = vmatmul.mubr.msk.f32.gmra.mxu0 %vm47_vm1, %v2028_v10  ;;  %1925 = vmatmul.mubr.msk.f32.gmra.mxu1 %vm47_vm1, %v2028_v10 }
  0x81   :  { %1373 = vmatprep.mubr.f32.mxu0 %v1967_v3  ;;  %1468 = vmatprep.mubr.f32.mxu1 %v1967_v3 }
  0x84   :  { %1919 = vmatmul.mubr.msk.f32.gmra.mxu0 %vm47_vm1, %v2049_v13  ;;  %1926 = vmatmul.mubr.msk.f32.gmra.mxu1 %vm47_vm1, %v2049_v13 }
  0x85   :  { %1379 = vmatprep.mubr.f32.mxu0 %v1967_v3  ;;  %1474 = vmatprep.mubr.f32.mxu1 %v1967_v3 }
  0x88   :  { %1920 = vmatmul.mubr.msk.f32.gmra.mxu0 %vm47_vm1, %v2062_v14  ;;  %1927 = vmatmul.mubr.msk.f32.gmra.mxu1 %vm47_vm1, %v2062_v14 }
  0x89   :  { %1385 = vmatprep.mubr.f32.mxu0 %v1967_v3  ;;  %1480 = vmatprep.mubr.f32.mxu1 %v1967_v3 }
  0x8c   :  { %1921 = vmatmul.mubr.msk.f32.gmra.mxu0 %vm47_vm1, %v2073_v15  ;;  %1928 = vmatmul.mubr.msk.f32.gmra.mxu1 %vm47_vm1, %v2073_v15 }
  0x8d   :  { %1551 = vmatprep.mubr.f32.mxu0 %v1967_v3  ;;  %1950 = vmatprep.mubr.msk.f32.mxu1 %vm1968_vm2, %v1967_v3 }
  0x90   :  { %1931 = vmatmul.mubr.msk.f32.vlgmr.msra.gmra.mxu0 %vm47_vm1, %v2003_v5  ;;  %1951 = vmatmul.mubr.msk.f32.vlgmr.msra.gmra.mxu1 %vm47_vm1, %v2003_v5 }
  0x91   :  { %1557 = vmatprep.mubr.f32.mxu0 %v1967_v3  ;;  %1953 = vmatprep.mubr.msk.f32.mxu1 %vm1968_vm2, %v1967_v3 }
  0x94   :  { %1932 = vmatmul.mubr.msk.f32.gmra.mxu0 %vm47_vm1, %v2028_v10  ;;  %1954 = vmatmul.mubr.msk.f32.gmra.mxu1 %vm47_vm1, %v2028_v10 }
  0x95   :  { %1563 = vmatprep.mubr.f32.mxu0 %v1967_v3  ;;  %1956 = vmatprep.mubr.msk.f32.mxu1 %vm1968_vm2, %v1967_v3 }
  0x98   :  { %1933 = vmatmul.mubr.msk.f32.gmra.mxu0 %vm47_vm1, %v2049_v13  ;;  %1957 = vmatmul.mubr.msk.f32.gmra.mxu1 %vm47_vm1, %v2049_v13 }
  0x99   :  { %1569 = vmatprep.mubr.f32.mxu0 %v1967_v3  ;;  %1959 = vmatprep.mubr.msk.f32.mxu1 %vm1968_vm2, %v1967_v3 }
  0x9c   :  { %1934 = vmatmul.mubr.msk.f32.gmra.mxu0 %vm47_vm1, %v2062_v14  ;;  %1960 = vmatmul.mubr.msk.f32.gmra.mxu1 %vm47_vm1, %v2062_v14 }
  0x9d   :  { %1575 = vmatprep.mubr.f32.mxu0 %v1967_v3  ;;  %1962 = vmatprep.mubr.msk.f32.mxu1 %vm1968_vm2, %v1967_v3 }
  0xa0   :  { %1935 = vmatmul.mubr.msk.f32.gmra.mxu0 %vm47_vm1, %v2073_v15  ;;  %1963 = vmatmul.mubr.msk.f32.gmra.mxu1 %vm47_vm1, %v2073_v15 }
  0xc4   :  { %v223_v37 = vpop.f32.mrf.mxu0  ;;  %v318_v38 = vpop.f32.mrf.mxu1 }
  0xc5   :  { %1672 = vst [vmem:[%s2846_s2] sm:$0xff] %v223_v37  ;;  %1674 = vst [vmem:[%s2846_s2 + $0x10] sm:$0xff] %v318_v38 }
  0xc6   :  { %v225_v39 = vpop.f32.mrf.mxu0  ;;  %v320_v40 = vpop.f32.mrf.mxu1 }
  0xc7   :  { %1673 = vst [vmem:[%s2846_s2 + $0x8] sm:$0xff] %v225_v39  ;;  %1675 = vst [vmem:[%s2846_s2 + $0x18] sm:$0xff] %v320_v40 }
  0xc8   :  { %v229_v41 = vpop.f32.mrf.mxu0  ;;  %v324_v42 = vpop.f32.mrf.mxu1 }
  0xc9   :  { %1703 = vst [vmem:[%s2846_s2 + $0xf8] sm:$0xff] %v229_v41  ;;  %1705 = vst [vmem:[%s2846_s2 + $0x108] sm:$0xff] %v324_v42 }
  0xca   :  { %v231_v43 = vpop.f32.mrf.mxu0  ;;  %v326_v44 = vpop.f32.mrf.mxu1 }
  0xcb   :  { %1704 = vst [vmem:[%s2846_s2 + $0x100] sm:$0xff] %v231_v43  ;;  %1706 = vst [vmem:[%s2846_s2 + $0x110] sm:$0xff] %v326_v44 }
  0xcc   :  { %v235_v45 = vpop.f32.mrf.mxu0  ;;  %v330_v46 = vpop.f32.mrf.mxu1 }
  0xcd   :  { %1734 = vst [vmem:[%s2846_s2 + $0x1f0] sm:$0xff] %v235_v45  ;;  %1736 = vst [vmem:[%s2846_s2 + $0x200] sm:$0xff] %v330_v46 }
  0xce   :  { %v237_v47 = vpop.f32.mrf.mxu0  ;;  %v332_v48 = vpop.f32.mrf.mxu1 }
  0xcf   :  { %1735 = vst [vmem:[%s2846_s2 + $0x1f8] sm:$0xff] %v237_v47  ;;  %1737 = vst [vmem:[%s2846_s2 + $0x208] sm:$0xff] %v332_v48 }
  0xd0   :  { %v241_v49 = vpop.f32.mrf.mxu0  ;;  %v336_v50 = vpop.f32.mrf.mxu1 }
  0xd1   :  { %1765 = vst [vmem:[%s2846_s2 + $0x2e8] sm:$0xff] %v241_v49  ;;  %1767 = vst [vmem:[%s2846_s2 + $0x2f8] sm:$0xff] %v336_v50 }
  0xd2   :  { %v243_v51 = vpop.f32.mrf.mxu0  ;;  %v338_v52 = vpop.f32.mrf.mxu1 }
  0xd3   :  { %1766 = vst [vmem:[%s2846_s2 + $0x2f0] sm:$0xff] %v243_v51  ;;  %1768 = vst [vmem:[%s2846_s2 + $0x300] sm:$0xff] %v338_v52 }
  0xd4   :  { %v247_v53 = vpop.f32.mrf.mxu0  ;;  %v342_v54 = vpop.f32.mrf.mxu1 }
  0xd5   :  { %1796 = vst [vmem:[%s2846_s2 + $0x3e0] sm:$0xff] %v247_v53  ;;  %1798 = vst [vmem:[%s2846_s2 + $0x3f0] sm:$0xff] %v342_v54 }
  0xd6   :  { %v249_v55 = vpop.f32.mrf.mxu0  ;;  %v344_v56 = vpop.f32.mrf.mxu1 }
  0xd7   :  { %1797 = vst [vmem:[%s2846_s2 + $0x3e8] sm:$0xff] %v249_v55  ;;  %1799 = vst [vmem:[%s2846_s2 + $0x3f8] sm:$0xff] %v344_v56 }
  0xd8   :  { %v413_v57 = vpop.f32.mrf.mxu0  ;;  %v508_v58 = vpop.f32.mrf.mxu1 }
  0xd9   :  { %1676 = vst [vmem:[%s2846_s2 + $0x20] sm:$0xff] %v413_v57  ;;  %1678 = vst [vmem:[%s2846_s2 + $0x30] sm:$0xff] %v508_v58 }
  0xda   :  { %v415_v59 = vpop.f32.mrf.mxu0  ;;  %v510_v60 = vpop.f32.mrf.mxu1 }
  0xdb   :  { %1677 = vst [vmem:[%s2846_s2 + $0x28] sm:$0xff] %v415_v59  ;;  %1679 = vst [vmem:[%s2846_s2 + $0x38] sm:$0xff] %v510_v60 }
  0xdc   :  { %v419_v61 = vpop.f32.mrf.mxu0  ;;  %v514_v62 = vpop.f32.mrf.mxu1 }
  0xdd   :  { %1707 = vst [vmem:[%s2846_s2 + $0x118] sm:$0xff] %v419_v61  ;;  %1709 = vst [vmem:[%s2846_s2 + $0x128] sm:$0xff] %v514_v62 }
  0xde   :  { %v421_v63 = vpop.f32.mrf.mxu0  ;;  %v516_v0 = vpop.f32.mrf.mxu1 }
  0xdf   :  { %1708 = vst [vmem:[%s2846_s2 + $0x120] sm:$0xff] %v421_v63  ;;  %1710 = vst [vmem:[%s2846_s2 + $0x130] sm:$0xff] %v516_v0 }
  0xe0   :  { %v425_v1 = vpop.f32.mrf.mxu0  ;;  %v520_v2 = vpop.f32.mrf.mxu1 }
  0xe1   :  { %1738 = vst [vmem:[%s2846_s2 + $0x210] sm:$0xff] %v425_v1  ;;  %1740 = vst [vmem:[%s2846_s2 + $0x220] sm:$0xff] %v520_v2 }
  0xe2   :  { %v427_v3 = vpop.f32.mrf.mxu0  ;;  %v522_v4 = vpop.f32.mrf.mxu1 }
  0xe3   :  { %1739 = vst [vmem:[%s2846_s2 + $0x218] sm:$0xff] %v427_v3  ;;  %1741 = vst [vmem:[%s2846_s2 + $0x228] sm:$0xff] %v522_v4 }
  0xe4   :  { %v431_v5 = vpop.f32.mrf.mxu0  ;;  %v526_v6 = vpop.f32.mrf.mxu1 }
  0xe5   :  { %1769 = vst [vmem:[%s2846_s2 + $0x308] sm:$0xff] %v431_v5  ;;  %1771 = vst [vmem:[%s2846_s2 + $0x318] sm:$0xff] %v526_v6 }
  0xe6   :  { %v433_v7 = vpop.f32.mrf.mxu0  ;;  %v528_v8 = vpop.f32.mrf.mxu1 }
  0xe7   :  { %1770 = vst [vmem:[%s2846_s2 + $0x310] sm:$0xff] %v433_v7  ;;  %1772 = vst [vmem:[%s2846_s2 + $0x320] sm:$0xff] %v528_v8 }
  0xe8   :  { %v437_v9 = vpop.f32.mrf.mxu0  ;;  %v532_v10 = vpop.f32.mrf.mxu1 }
  0xe9   :  { %1800 = vst [vmem:[%s2846_s2 + $0x400] sm:$0xff] %v437_v9  ;;  %1802 = vst [vmem:[%s2846_s2 + $0x410] sm:$0xff] %v532_v10 }
  0xea   :  { %v439_v11 = vpop.f32.mrf.mxu0  ;;  %v534_v12 = vpop.f32.mrf.mxu1 }
  0xeb   :  { %1801 = vst [vmem:[%s2846_s2 + $0x408] sm:$0xff] %v439_v11  ;;  %1803 = vst [vmem:[%s2846_s2 + $0x418] sm:$0xff] %v534_v12 }
  0xec   :  { %v603_v13 = vpop.f32.mrf.mxu0  ;;  %v698_v14 = vpop.f32.mrf.mxu1 }
  0xed   :  { %1680 = vst [vmem:[%s2846_s2 + $0x40] sm:$0xff] %v603_v13  ;;  %1682 = vst [vmem:[%s2846_s2 + $0x50] sm:$0xff] %v698_v14 }
  0xee   :  { %v605_v15 = vpop.f32.mrf.mxu0  ;;  %v700_v16 = vpop.f32.mrf.mxu1 }
  0xef   :  { %1681 = vst [vmem:[%s2846_s2 + $0x48] sm:$0xff] %v605_v15  ;;  %1683 = vst [vmem:[%s2846_s2 + $0x58] sm:$0xff] %v700_v16 }
  0xf0   :  { %v609_v17 = vpop.f32.mrf.mxu0  ;;  %v704_v18 = vpop.f32.mrf.mxu1 }
  0xf1   :  { %1711 = vst [vmem:[%s2846_s2 + $0x138] sm:$0xff] %v609_v17  ;;  %1713 = vst [vmem:[%s2846_s2 + $0x148] sm:$0xff] %v704_v18 }
  0xf2   :  { %v611_v19 = vpop.f32.mrf.mxu0  ;;  %v706_v20 = vpop.f32.mrf.mxu1 }
  0xf3   :  { %1712 = vst [vmem:[%s2846_s2 + $0x140] sm:$0xff] %v611_v19  ;;  %1714 = vst [vmem:[%s2846_s2 + $0x150] sm:$0xff] %v706_v20 }
  0xf4   :  { %v615_v21 = vpop.f32.mrf.mxu0  ;;  %v710_v22 = vpop.f32.mrf.mxu1 }
  0xf5   :  { %1742 = vst [vmem:[%s2846_s2 + $0x230] sm:$0xff] %v615_v21  ;;  %1744 = vst [vmem:[%s2846_s2 + $0x240] sm:$0xff] %v710_v22 }
  0xf6   :  { %v617_v23 = vpop.f32.mrf.mxu0  ;;  %v712_v24 = vpop.f32.mrf.mxu1 }
  0xf7   :  { %1743 = vst [vmem:[%s2846_s2 + $0x238] sm:$0xff] %v617_v23  ;;  %1745 = vst [vmem:[%s2846_s2 + $0x248] sm:$0xff] %v712_v24 }
  0xf8   :  { %v621_v25 = vpop.f32.mrf.mxu0  ;;  %v716_v26 = vpop.f32.mrf.mxu1 }
  0xf9   :  { %1773 = vst [vmem:[%s2846_s2 + $0x328] sm:$0xff] %v621_v25  ;;  %1775 = vst [vmem:[%s2846_s2 + $0x338] sm:$0xff] %v716_v26 }
  0xfa   :  { %v623_v27 = vpop.f32.mrf.mxu0  ;;  %v718_v28 = vpop.f32.mrf.mxu1 }
  0xfb   :  { %1774 = vst [vmem:[%s2846_s2 + $0x330] sm:$0xff] %v623_v27  ;;  %1776 = vst [vmem:[%s2846_s2 + $0x340] sm:$0xff] %v718_v28 }
  0xfc   :  { %v627_v29 = vpop.f32.mrf.mxu0  ;;  %v722_v30 = vpop.f32.mrf.mxu1 }
  0xfd   :  { %1804 = vst [vmem:[%s2846_s2 + $0x420] sm:$0xff] %v627_v29  ;;  %1806 = vst [vmem:[%s2846_s2 + $0x430] sm:$0xff] %v722_v30 }
  0xfe   :  { %v629_v31 = vpop.f32.mrf.mxu0  ;;  %v724_v32 = vpop.f32.mrf.mxu1 }
  0xff   :  { %1805 = vst [vmem:[%s2846_s2 + $0x428] sm:$0xff] %v629_v31  ;;  %1807 = vst [vmem:[%s2846_s2 + $0x438] sm:$0xff] %v724_v32 }
 0x100   :  { %v793_v33 = vpop.f32.mrf.mxu0  ;;  %v888_v34 = vpop.f32.mrf.mxu1 }
 0x101   :  { %1684 = vst [vmem:[%s2846_s2 + $0x60] sm:$0xff] %v793_v33  ;;  %1686 = vst [vmem:[%s2846_s2 + $0x70] sm:$0xff] %v888_v34 }
 0x102   :  { %v795_v35 = vpop.f32.mrf.mxu0  ;;  %v890_v36 = vpop.f32.mrf.mxu1 }
 0x103   :  { %1685 = vst [vmem:[%s2846_s2 + $0x68] sm:$0xff] %v795_v35  ;;  %1687 = vst [vmem:[%s2846_s2 + $0x78] sm:$0xff] %v890_v36 }
 0x104   :  { %v799_v37 = vpop.f32.mrf.mxu0  ;;  %v894_v38 = vpop.f32.mrf.mxu1 }
 0x105   :  { %1715 = vst [vmem:[%s2846_s2 + $0x158] sm:$0xff] %v799_v37  ;;  %1717 = vst [vmem:[%s2846_s2 + $0x168] sm:$0xff] %v894_v38 }
 0x106   :  { %v801_v39 = vpop.f32.mrf.mxu0  ;;  %v896_v40 = vpop.f32.mrf.mxu1 }
 0x107   :  { %1716 = vst [vmem:[%s2846_s2 + $0x160] sm:$0xff] %v801_v39  ;;  %1718 = vst [vmem:[%s2846_s2 + $0x170] sm:$0xff] %v896_v40 }
 0x108   :  { %v805_v41 = vpop.f32.mrf.mxu0  ;;  %v900_v42 = vpop.f32.mrf.mxu1 }
 0x109   :  { %1746 = vst [vmem:[%s2846_s2 + $0x250] sm:$0xff] %v805_v41  ;;  %1748 = vst [vmem:[%s2846_s2 + $0x260] sm:$0xff] %v900_v42 }
 0x10a   :  { %v807_v43 = vpop.f32.mrf.mxu0  ;;  %v902_v44 = vpop.f32.mrf.mxu1 }
 0x10b   :  { %1747 = vst [vmem:[%s2846_s2 + $0x258] sm:$0xff] %v807_v43  ;;  %1749 = vst [vmem:[%s2846_s2 + $0x268] sm:$0xff] %v902_v44 }
 0x10c   :  { %v811_v45 = vpop.f32.mrf.mxu0  ;;  %v906_v46 = vpop.f32.mrf.mxu1 }
 0x10d   :  { %1777 = vst [vmem:[%s2846_s2 + $0x348] sm:$0xff] %v811_v45  ;;  %1779 = vst [vmem:[%s2846_s2 + $0x358] sm:$0xff] %v906_v46 }
 0x10e   :  { %v813_v47 = vpop.f32.mrf.mxu0  ;;  %v908_v48 = vpop.f32.mrf.mxu1 }
 0x10f   :  { %1778 = vst [vmem:[%s2846_s2 + $0x350] sm:$0xff] %v813_v47  ;;  %1780 = vst [vmem:[%s2846_s2 + $0x360] sm:$0xff] %v908_v48 }
 0x110   :  { %v817_v49 = vpop.f32.mrf.mxu0  ;;  %v912_v50 = vpop.f32.mrf.mxu1 }
 0x111   :  { %1808 = vst [vmem:[%s2846_s2 + $0x440] sm:$0xff] %v817_v49  ;;  %1810 = vst [vmem:[%s2846_s2 + $0x450] sm:$0xff] %v912_v50 }
 0x112   :  { %v819_v51 = vpop.f32.mrf.mxu0  ;;  %v914_v52 = vpop.f32.mrf.mxu1 }
 0x113   :  { %1809 = vst [vmem:[%s2846_s2 + $0x448] sm:$0xff] %v819_v51  ;;  %1811 = vst [vmem:[%s2846_s2 + $0x458] sm:$0xff] %v914_v52 }
 0x114   :  { %v983_v53 = vpop.f32.mrf.mxu0  ;;  %v1078_v54 = vpop.f32.mrf.mxu1 }
 0x115   :  { %1688 = vst [vmem:[%s2846_s2 + $0x80] sm:$0xff] %v983_v53  ;;  %1690 = vst [vmem:[%s2846_s2 + $0x90] sm:$0xff] %v1078_v54 }
 0x116   :  { %v985_v55 = vpop.f32.mrf.mxu0  ;;  %v1080_v56 = vpop.f32.mrf.mxu1 }
 0x117   :  { %1689 = vst [vmem:[%s2846_s2 + $0x88] sm:$0xff] %v985_v55  ;;  %1691 = vst [vmem:[%s2846_s2 + $0x98] sm:$0xff] %v1080_v56 }
 0x118   :  { %v989_v57 = vpop.f32.mrf.mxu0  ;;  %v1084_v58 = vpop.f32.mrf.mxu1 }
 0x119   :  { %1719 = vst [vmem:[%s2846_s2 + $0x178] sm:$0xff] %v989_v57  ;;  %1721 = vst [vmem:[%s2846_s2 + $0x188] sm:$0xff] %v1084_v58 }
 0x11a   :  { %v991_v59 = vpop.f32.mrf.mxu0  ;;  %v1086_v60 = vpop.f32.mrf.mxu1 }
 0x11b   :  { %1720 = vst [vmem:[%s2846_s2 + $0x180] sm:$0xff] %v991_v59  ;;  %1722 = vst [vmem:[%s2846_s2 + $0x190] sm:$0xff] %v1086_v60 }
 0x11c   :  { %v995_v61 = vpop.f32.mrf.mxu0  ;;  %v1090_v62 = vpop.f32.mrf.mxu1 }
 0x11d   :  { %1750 = vst [vmem:[%s2846_s2 + $0x270] sm:$0xff] %v995_v61  ;;  %1752 = vst [vmem:[%s2846_s2 + $0x280] sm:$0xff] %v1090_v62 }
 0x11e   :  { %v997_v63 = vpop.f32.mrf.mxu0  ;;  %v1092_v0 = vpop.f32.mrf.mxu1 }
 0x11f   :  { %1751 = vst [vmem:[%s2846_s2 + $0x278] sm:$0xff] %v997_v63  ;;  %1753 = vst [vmem:[%s2846_s2 + $0x288] sm:$0xff] %v1092_v0 }
 0x120   :  { %v1001_v1 = vpop.f32.mrf.mxu0  ;;  %v1096_v2 = vpop.f32.mrf.mxu1 }
 0x121   :  { %1781 = vst [vmem:[%s2846_s2 + $0x368] sm:$0xff] %v1001_v1  ;;  %1783 = vst [vmem:[%s2846_s2 + $0x378] sm:$0xff] %v1096_v2 }
 0x122   :  { %v1003_v3 = vpop.f32.mrf.mxu0  ;;  %v1098_v4 = vpop.f32.mrf.mxu1 }
 0x123   :  { %1782 = vst [vmem:[%s2846_s2 + $0x370] sm:$0xff] %v1003_v3  ;;  %1784 = vst [vmem:[%s2846_s2 + $0x380] sm:$0xff] %v1098_v4 }
 0x124   :  { %v1007_v5 = vpop.f32.mrf.mxu0  ;;  %v1102_v6 = vpop.f32.mrf.mxu1 }
 0x125   :  { %1812 = vst [vmem:[%s2846_s2 + $0x460] sm:$0xff] %v1007_v5  ;;  %1814 = vst [vmem:[%s2846_s2 + $0x470] sm:$0xff] %v1102_v6 }
 0x126   :  { %v1009_v7 = vpop.f32.mrf.mxu0  ;;  %v1104_v8 = vpop.f32.mrf.mxu1 }
 0x127   :  { %1813 = vst [vmem:[%s2846_s2 + $0x468] sm:$0xff] %v1009_v7  ;;  %1815 = vst [vmem:[%s2846_s2 + $0x478] sm:$0xff] %v1104_v8 }
 0x128   :  { %v1173_v9 = vpop.f32.mrf.mxu0  ;;  %v1268_v10 = vpop.f32.mrf.mxu1 }
 0x129   :  { %1692 = vst [vmem:[%s2846_s2 + $0xa0] sm:$0xff] %v1173_v9  ;;  %1694 = vst [vmem:[%s2846_s2 + $0xb0] sm:$0xff] %v1268_v10 }
 0x12a   :  { %v1175_v11 = vpop.f32.mrf.mxu0  ;;  %v1270_v12 = vpop.f32.mrf.mxu1 }
 0x12b   :  { %1693 = vst [vmem:[%s2846_s2 + $0xa8] sm:$0xff] %v1175_v11  ;;  %1695 = vst [vmem:[%s2846_s2 + $0xb8] sm:$0xff] %v1270_v12 }
 0x12c   :  { %v1179_v13 = vpop.f32.mrf.mxu0  ;;  %v1274_v14 = vpop.f32.mrf.mxu1 }
 0x12d   :  { %1723 = vst [vmem:[%s2846_s2 + $0x198] sm:$0xff] %v1179_v13  ;;  %1725 = vst [vmem:[%s2846_s2 + $0x1a8] sm:$0xff] %v1274_v14 }
 0x12e   :  { %v1181_v15 = vpop.f32.mrf.mxu0  ;;  %v1276_v16 = vpop.f32.mrf.mxu1 }
 0x12f   :  { %1724 = vst [vmem:[%s2846_s2 + $0x1a0] sm:$0xff] %v1181_v15  ;;  %1726 = vst [vmem:[%s2846_s2 + $0x1b0] sm:$0xff] %v1276_v16 }
 0x130   :  { %v1185_v17 = vpop.f32.mrf.mxu0  ;;  %v1280_v18 = vpop.f32.mrf.mxu1 }
 0x131   :  { %1754 = vst [vmem:[%s2846_s2 + $0x290] sm:$0xff] %v1185_v17  ;;  %1756 = vst [vmem:[%s2846_s2 + $0x2a0] sm:$0xff] %v1280_v18 }
 0x132   :  { %v1187_v19 = vpop.f32.mrf.mxu0  ;;  %v1282_v20 = vpop.f32.mrf.mxu1 }
 0x133   :  { %1755 = vst [vmem:[%s2846_s2 + $0x298] sm:$0xff] %v1187_v19  ;;  %1757 = vst [vmem:[%s2846_s2 + $0x2a8] sm:$0xff] %v1282_v20 }
 0x134   :  { %v1191_v21 = vpop.f32.mrf.mxu0  ;;  %v1286_v22 = vpop.f32.mrf.mxu1 }
 0x135   :  { %1785 = vst [vmem:[%s2846_s2 + $0x388] sm:$0xff] %v1191_v21  ;;  %1787 = vst [vmem:[%s2846_s2 + $0x398] sm:$0xff] %v1286_v22 }
 0x136   :  { %v1193_v23 = vpop.f32.mrf.mxu0  ;;  %v1288_v24 = vpop.f32.mrf.mxu1 }
 0x137   :  { %1786 = vst [vmem:[%s2846_s2 + $0x390] sm:$0xff] %v1193_v23  ;;  %1788 = vst [vmem:[%s2846_s2 + $0x3a0] sm:$0xff] %v1288_v24 }
 0x138   :  { %v1197_v25 = vpop.f32.mrf.mxu0  ;;  %v1292_v26 = vpop.f32.mrf.mxu1 }
 0x139   :  { %1816 = vst [vmem:[%s2846_s2 + $0x480] sm:$0xff] %v1197_v25  ;;  %1818 = vst [vmem:[%s2846_s2 + $0x490] sm:$0xff] %v1292_v26 }
 0x13a   :  { %v1199_v27 = vpop.f32.mrf.mxu0  ;;  %v1294_v28 = vpop.f32.mrf.mxu1 }
 0x13b   :  { %1817 = vst [vmem:[%s2846_s2 + $0x488] sm:$0xff] %v1199_v27  ;;  %1819 = vst [vmem:[%s2846_s2 + $0x498] sm:$0xff] %v1294_v28 }
 0x13c   :  { %v1363_v29 = vpop.f32.mrf.mxu0  ;;  %v1458_v30 = vpop.f32.mrf.mxu1 }
 0x13d   :  { %1696 = vst [vmem:[%s2846_s2 + $0xc0] sm:$0xff] %v1363_v29  ;;  %1698 = vst [vmem:[%s2846_s2 + $0xd0] sm:$0xff] %v1458_v30 }
 0x13e   :  { %v1365_v31 = vpop.f32.mrf.mxu0  ;;  %v1460_v32 = vpop.f32.mrf.mxu1 }
 0x13f   :  { %1697 = vst [vmem:[%s2846_s2 + $0xc8] sm:$0xff] %v1365_v31  ;;  %1699 = vst [vmem:[%s2846_s2 + $0xd8] sm:$0xff] %v1460_v32 }
 0x140   :  { %v1369_v33 = vpop.f32.mrf.mxu0  ;;  %v1464_v34 = vpop.f32.mrf.mxu1 }
 0x141   :  { %1727 = vst [vmem:[%s2846_s2 + $0x1b8] sm:$0xff] %v1369_v33  ;;  %1729 = vst [vmem:[%s2846_s2 + $0x1c8] sm:$0xff] %v1464_v34 }
 0x142   :  { %v1371_v35 = vpop.f32.mrf.mxu0  ;;  %v1466_v36 = vpop.f32.mrf.mxu1 }
 0x143   :  { %1728 = vst [vmem:[%s2846_s2 + $0x1c0] sm:$0xff] %v1371_v35  ;;  %1730 = vst [vmem:[%s2846_s2 + $0x1d0] sm:$0xff] %v1466_v36 }
 0x144   :  { %v1375_v37 = vpop.f32.mrf.mxu0  ;;  %v1470_v38 = vpop.f32.mrf.mxu1 }
 0x145   :  { %1758 = vst [vmem:[%s2846_s2 + $0x2b0] sm:$0xff] %v1375_v37  ;;  %1760 = vst [vmem:[%s2846_s2 + $0x2c0] sm:$0xff] %v1470_v38 }
 0x146   :  { %v1377_v39 = vpop.f32.mrf.mxu0  ;;  %v1472_v40 = vpop.f32.mrf.mxu1 }
 0x147   :  { %1759 = vst [vmem:[%s2846_s2 + $0x2b8] sm:$0xff] %v1377_v39  ;;  %1761 = vst [vmem:[%s2846_s2 + $0x2c8] sm:$0xff] %v1472_v40 }
 0x148   :  { %v1381_v41 = vpop.f32.mrf.mxu0  ;;  %v1476_v42 = vpop.f32.mrf.mxu1 }
 0x149   :  { %1789 = vst [vmem:[%s2846_s2 + $0x3a8] sm:$0xff] %v1381_v41  ;;  %1791 = vst [vmem:[%s2846_s2 + $0x3b8] sm:$0xff] %v1476_v42 }
 0x14a   :  { %v1383_v43 = vpop.f32.mrf.mxu0  ;;  %v1478_v44 = vpop.f32.mrf.mxu1 }
 0x14b   :  { %1790 = vst [vmem:[%s2846_s2 + $0x3b0] sm:$0xff] %v1383_v43  ;;  %1792 = vst [vmem:[%s2846_s2 + $0x3c0] sm:$0xff] %v1478_v44 }
 0x14c   :  { %v1387_v45 = vpop.f32.mrf.mxu0  ;;  %v1482_v46 = vpop.f32.mrf.mxu1 }
 0x14d   :  { %1820 = vst [vmem:[%s2846_s2 + $0x4a0] sm:$0xff] %v1387_v45  ;;  %1822 = vst [vmem:[%s2846_s2 + $0x4b0] sm:$0xff] %v1482_v46 }
 0x14e   :  { %v1389_v47 = vpop.f32.mrf.mxu0  ;;  %v1484_v48 = vpop.f32.mrf.mxu1 }
 0x14f   :  { %1821 = vst [vmem:[%s2846_s2 + $0x4a8] sm:$0xff] %v1389_v47  ;;  %1823 = vst [vmem:[%s2846_s2 + $0x4b8] sm:$0xff] %v1484_v48 }
 0x150   :  { %v1553_v49 = vpop.f32.mrf.mxu0  ;;  %v1648_v50 = vpop.f32.mrf.mxu1 }
 0x151   :  { %1700 = vst [vmem:[%s2846_s2 + $0xe0] sm:$0xff] %v1553_v49  ;;  %1702 = vst [vmem:[%s2846_s2 + $0xf0] sm:$0xff] %v1648_v50 }
 0x152   :  { %v1555_v51 = vpop.f32.mrf.mxu0  ;;  %v1952_v52 = vpop.f32.mrf.mxu1 }
 0x153   :  { %1701 = vst [vmem:[%s2846_s2 + $0xe8] sm:$0xff] %v1555_v51 }
 0x154   :  { %v1559_v53 = vpop.f32.mrf.mxu0  ;;  %v1653_v54 = vpop.f32.mrf.mxu1 }
 0x155   :  { %1731 = vst [vmem:[%s2846_s2 + $0x1d8] sm:$0xff] %v1559_v53  ;;  %1733 = vst [vmem:[%s2846_s2 + $0x1e8] sm:$0xff] %v1653_v54 }
 0x156   :  { %v1561_v55 = vpop.f32.mrf.mxu0  ;;  %v1955_v56 = vpop.f32.mrf.mxu1 }
 0x157   :  { %1732 = vst [vmem:[%s2846_s2 + $0x1e0] sm:$0xff] %v1561_v55 }
 0x158   :  { %v1565_v57 = vpop.f32.mrf.mxu0  ;;  %v1658_v58 = vpop.f32.mrf.mxu1 }
 0x159   :  { %1762 = vst [vmem:[%s2846_s2 + $0x2d0] sm:$0xff] %v1565_v57  ;;  %1764 = vst [vmem:[%s2846_s2 + $0x2e0] sm:$0xff] %v1658_v58 }
 0x15a   :  { %v1567_v59 = vpop.f32.mrf.mxu0  ;;  %v1958_v60 = vpop.f32.mrf.mxu1 }
 0x15b   :  { %1763 = vst [vmem:[%s2846_s2 + $0x2d8] sm:$0xff] %v1567_v59 }
 0x15c   :  { %v1571_v61 = vpop.f32.mrf.mxu0  ;;  %v1663_v62 = vpop.f32.mrf.mxu1 }
 0x15d   :  { %1793 = vst [vmem:[%s2846_s2 + $0x3c8] sm:$0xff] %v1571_v61  ;;  %1795 = vst [vmem:[%s2846_s2 + $0x3d8] sm:$0xff] %v1663_v62 }
 0x15e   :  { %v1573_v63 = vpop.f32.mrf.mxu0  ;;  %v1961_v0 = vpop.f32.mrf.mxu1 }
 0x15f   :  { %1794 = vst [vmem:[%s2846_s2 + $0x3d0] sm:$0xff] %v1573_v63 }
 0x160   :  { %v1577_v1 = vpop.f32.mrf.mxu0  ;;  %v1668_v2 = vpop.f32.mrf.mxu1 }
 0x161   :  { %1824 = vst [vmem:[%s2846_s2 + $0x4c0] sm:$0xff] %v1577_v1  ;;  %1826 = vst [vmem:[%s2846_s2 + $0x4d0] sm:$0xff] %v1668_v2 }
 0x162   :  { %v1579_v3 = vpop.f32.mrf.mxu0  ;;  %v1964_v4 = vpop.f32.mrf.mxu1 }
 0x163   :  { %1825 = vst [vmem:[%s2846_s2 + $0x4c8] sm:$0xff] %v1579_v3 }

</bundles_post_ra>
